<compile_context>
chip_gen: v6e
topology: v6e:2x2x1
jax: 0.10.0
libtpu: 0.0.40
codegen_flags: <defaults>
</compile_context>

<pallas_src>
import jax
import jax.numpy as jnp
from jax.experimental import pallas as pl
from jax.experimental.pallas import tpu as pltpu


def _align8(n):
    return ((n + 7) // 8) * 8


def fold_model_classifier_forward(crop, params):
    enc_w, enc_b, w1, b1, w2, b2 = params
    B, C, H, W = crop.shape
    n_enc, _, F = enc_w.shape
    n_cla, _, Hd = w1.shape
    K = w2.shape[2]

    EF = n_enc * F                       # lane width of fused encoder output
    CH = n_cla * Hd                      # classifier hidden lanes per encoder
    ECH = n_enc * CH                     # total hidden lanes
    L = max(EF, ECH, K)                  # common lane width of the param slab

    # 8-sublane-aligned row offsets inside the packed parameter slab.
    off_encw = 0
    off_encb = _align8(C)
    off_w1 = off_encb + 8
    off_b1 = off_w1 + _align8(L)
    off_w2 = off_b1 + 8
    off_b2 = off_w2 + _align8(L)
    R = off_b2 + 8

    f32 = jnp.float32

    # ------------------------------------------------------------------
    # Pack all parameters into one zero-padded lane-dense buffer (1 DMA).
    # Zero padding makes every in-kernel contraction shape-exact without
    # any lane slicing.
    # ------------------------------------------------------------------
    encw_cat = jnp.transpose(enc_w.astype(f32), (1, 0, 2)).reshape(C, EF)
    encb_cat = enc_b.astype(f32).reshape(EF)
    w1_cat = jnp.transpose(w1.astype(f32), (1, 0, 2)).reshape(F, CH)   # [F, CH]
    w1_blk = jnp.zeros((EF, ECH), f32)                                 # block-diag over encoders
    for e in range(n_enc):
        w1_blk = w1_blk.at[e * F:(e + 1) * F, e * CH:(e + 1) * CH].set(w1_cat)
    b1_cat = jnp.tile(b1.astype(f32).reshape(CH), n_enc)               # [ECH]
    w2_cat = jnp.tile(w2.astype(f32).reshape(CH, K), (n_enc, 1))       # [ECH, K]
    b2_sum = jnp.sum(b2.astype(f32), axis=0)                           # [K]

    P = jnp.zeros((R, L), f32)
    P = P.at[off_encw:off_encw + C, 0:EF].set(encw_cat)
    P = P.at[off_encb, 0:EF].set(encb_cat)
    P = P.at[off_w1:off_w1 + EF, 0:ECH].set(w1_blk)
    P = P.at[off_b1, 0:ECH].set(b1_cat)
    P = P.at[off_w2:off_w2 + ECH, 0:K].set(w2_cat)
    P = P.at[off_b2, 0:K].set(b2_sum)

    crop3 = crop.astype(f32).reshape(B, C, H * W)     # lane-dense pooling view

    inv_ec = 1.0 / (n_enc * n_cla)   # scale for the matmul term
    inv_c = 1.0 / n_cla              # scale for the encoder-independent b2 term

    # ------------------------------------------------------------------
    # Fused kernel: pool -> fused encoder matmul -> 2-matmul classifier
    # ensemble -> scaled means.  Three MXU pushes total, all lane-dense.
    # ------------------------------------------------------------------
    def kernel(crop_ref, p_ref, out_ref):
        pooled = jnp.mean(crop_ref[...], axis=-1)                     # [TB, C]

        encw = p_ref[pl.ds(off_encw, C), :]                           # [C, L]
        encb = p_ref[pl.ds(off_encb, 1), :]                           # [1, L]
        w1m = p_ref[pl.ds(off_w1, L), :]                              # [L, L]
        b1v = p_ref[pl.ds(off_b1, 1), :]
        w2m = p_ref[pl.ds(off_w2, L), :]
        b2v = p_ref[pl.ds(off_b2, 1), :]

        # All encoder heads in one matmul: [TB, E*F] lane-stacked.
        enc = jnp.dot(pooled, encw, preferred_element_type=f32) + encb
        # All (classifier, encoder) hidden activations in one matmul + ReLU.
        h = jnp.maximum(jnp.dot(enc, w1m, preferred_element_type=f32) + b1v, 0.0)
        # Sum over classifiers AND encoders falls out of the row-stacked w2.
        y = (jnp.dot(h, w2m, preferred_element_type=f32) * inv_ec
             + b2v * inv_c)                                           # [TB, L]
        out_ref[...] = y[:, :K]

    # Batch tiling: single block for small/odd B; 128-row blocks at scale.
    TB = 128 if (B > 128 and B % 128 == 0) else B
    grid = (pl.cdiv(B, TB),)

    return pl.pallas_call(
        kernel,
        out_shape=jax.ShapeDtypeStruct((B, K), f32),
        grid=grid,
        in_specs=[
            pl.BlockSpec((TB, C, H * W), lambda i: (i, 0, 0)),
            pl.BlockSpec((R, L), lambda i: (0, 0)),       # params resident
        ],
        out_specs=pl.BlockSpec((TB, K), lambda i: (i, 0)),
        compiler_params=pltpu.CompilerParams(
            dimension_semantics=("parallel",)),
    )(crop3, P)


# ---------------------------------------------------------------------------
# Pure-JAX reference (mirrors the PyTorch forward)
# ---------------------------------------------------------------------------
def reference_forward(crop, params):
    enc_w, enc_b, w1, b1, w2, b2 = params
    pooled = jnp.mean(crop, axis=(2, 3))                                   # [B, C]
    enc = jnp.einsum('bc,ecf->ebf', pooled, enc_w) + enc_b[:, None, :]     # [E, B, F]
    h = jnp.einsum('ebf,cfh->cebh', enc, w1) + b1[:, None, None, :]
    h = jnp.maximum(h, 0.0)
    y = jnp.einsum('cebh,chk->cebk', h, w2) + b2[:, None, None, :]
    per_cla = jnp.mean(y, axis=1)            # mean over encoders    -> [C, B, K]
    return jnp.mean(per_cla, axis=0)         # mean over classifiers -> [B, K]


if __name__ == "__main__":
    # Small shapes consistent with the module.
    B, C, H, W = 2, 4, 16, 16        # crop (NCHW)
    n_enc = 2                        # len(backbones)
    n_cla = 2                        # n_fold_classifier
    F = 32                           # features_size
    Hd = F // 4                      # hidden of FoldClassifier
    K = 3                            # n_classes

    key = jax.random.PRNGKey(0)
    ks = jax.random.split(key, 7)
    crop = jax.random.normal(ks[0], (B, C, H, W), jnp.float32)
    enc_w = jax.random.normal(ks[1], (n_enc, C, F), jnp.float32) * 0.05
    enc_b = jax.random.normal(ks[2], (n_enc, F), jnp.float32) * 0.05
    w1 = jax.random.normal(ks[3], (n_cla, F, Hd), jnp.float32) * 0.05
    b1 = jax.random.normal(ks[4], (n_cla, Hd), jnp.float32) * 0.05
    w2 = jax.random.normal(ks[5], (n_cla, Hd, K), jnp.float32) * 0.05
    b2 = jax.random.normal(ks[6], (n_cla, K), jnp.float32) * 0.05
    params = (enc_w, enc_b, w1, b1, w2, b2)

    out = fold_model_classifier_forward(crop, params)
    out = jax.block_until_ready(out)

    ref = reference_forward(crop, params)
    assert out.shape == (B, K), out.shape
    assert jnp.allclose(out, ref, atol=1e-5, rtol=1e-5), (out, ref)
    print("KERNEL_OK")
</pallas_src>

<mosaic_0001>
module attributes {stable_mosaic.version = 11 : i64} {
  func.func @kernel(%arg0: i32, %arg1: memref<2x4x256xf32, #tpu.memory_space<vmem>>, %arg2: memref<160x64xf32, #tpu.memory_space<vmem>>, %arg3: memref<2x3xf32, #tpu.memory_space<vmem>>) attributes {dimension_semantics = [#tpu.dimension_semantics<parallel>], iteration_bounds = array<i64: 1>, scalar_prefetch = 0 : i64, scratch_operands = 0 : i64, tpu.core_type = #tpu.core_type<tc>, window_params = [{transform_indices = @transform_0, window_bounds = array<i64: 2, 4, 256>}, {pipeline_mode = #tpu.pipeline_mode<synchronous>, transform_indices = @transform_1, window_bounds = array<i64: 160, 64>}, {transform_indices = @transform_2, window_bounds = array<i64: 2, 3>}]} {
    %c0 = arith.constant 0 : index
    %c0_0 = arith.constant 0 : index
    %c0_1 = arith.constant 0 : index
    %0 = vector.load %arg1[%c0, %c0_0, %c0_1] : memref<2x4x256xf32, #tpu.memory_space<vmem>>, vector<2x4x256xf32>
    %cst = arith.constant dense<0.000000e+00> : vector<2x4xf32>
    %1 = vector.multi_reduction <add>, %0, %cst [2] : vector<2x4x256xf32> to vector<2x4xf32>
    %cst_2 = arith.constant 2.560000e+02 : f32
    %2 = vector.broadcast %cst_2 : f32 to vector<2x4xf32>
    %3 = arith.divf %1, %2 : vector<2x4xf32>
    %c0_3 = arith.constant 0 : index
    %c0_4 = arith.constant 0 : index
    %4 = vector.load %arg2[%c0_3, %c0_4] : memref<160x64xf32, #tpu.memory_space<vmem>>, vector<4x64xf32>
    %c8 = arith.constant 8 : index
    %c0_5 = arith.constant 0 : index
    %5 = vector.load %arg2[%c8, %c0_5] : memref<160x64xf32, #tpu.memory_space<vmem>>, vector<1x64xf32>
    %c16 = arith.constant 16 : index
    %c0_6 = arith.constant 0 : index
    %6 = vector.load %arg2[%c16, %c0_6] : memref<160x64xf32, #tpu.memory_space<vmem>>, vector<64x64xf32>
    %c80 = arith.constant 80 : index
    %c0_7 = arith.constant 0 : index
    %7 = vector.load %arg2[%c80, %c0_7] : memref<160x64xf32, #tpu.memory_space<vmem>>, vector<1x64xf32>
    %c88 = arith.constant 88 : index
    %c0_8 = arith.constant 0 : index
    %8 = vector.load %arg2[%c88, %c0_8] : memref<160x64xf32, #tpu.memory_space<vmem>>, vector<64x64xf32>
    %c152 = arith.constant 152 : index
    %c0_9 = arith.constant 0 : index
    %9 = vector.load %arg2[%c152, %c0_9] : memref<160x64xf32, #tpu.memory_space<vmem>>, vector<1x64xf32>
    %cst_10 = arith.constant dense<0.000000e+00> : vector<2x64xf32>
    %10 = tpu.matmul %3, %4, %cst_10 {dimension_numbers = #tpu.dot_dimension_numbers<[1], [0], [0], [1], [0, 0, 1, 1], [], []>} : vector<2x4xf32>, vector<4x64xf32>, vector<2x64xf32> -> vector<2x64xf32>
    %11 = vector.broadcast %5 : vector<1x64xf32> to vector<2x64xf32>
    %12 = arith.addf %10, %11 : vector<2x64xf32>
    %cst_11 = arith.constant dense<0.000000e+00> : vector<2x64xf32>
    %13 = tpu.matmul %12, %6, %cst_11 {dimension_numbers = #tpu.dot_dimension_numbers<[1], [0], [0], [1], [0, 0, 1, 1], [], []>} : vector<2x64xf32>, vector<64x64xf32>, vector<2x64xf32> -> vector<2x64xf32>
    %14 = vector.broadcast %7 : vector<1x64xf32> to vector<2x64xf32>
    %15 = arith.addf %13, %14 : vector<2x64xf32>
    %cst_12 = arith.constant 0.000000e+00 : f32
    %16 = vector.broadcast %cst_12 : f32 to vector<2x64xf32>
    %17 = arith.maximumf %15, %16 : vector<2x64xf32>
    %cst_13 = arith.constant dense<0.000000e+00> : vector<2x64xf32>
    %18 = tpu.matmul %17, %8, %cst_13 {dimension_numbers = #tpu.dot_dimension_numbers<[1], [0], [0], [1], [0, 0, 1, 1], [], []>} : vector<2x64xf32>, vector<64x64xf32>, vector<2x64xf32> -> vector<2x64xf32>
    %cst_14 = arith.constant 2.500000e-01 : f32
    %19 = vector.broadcast %cst_14 : f32 to vector<2x64xf32>
    %20 = arith.mulf %18, %19 : vector<2x64xf32>
    %cst_15 = arith.constant 5.000000e-01 : f32
    %21 = vector.broadcast %cst_15 : f32 to vector<1x64xf32>
    %22 = arith.mulf %9, %21 : vector<1x64xf32>
    %23 = vector.broadcast %22 : vector<1x64xf32> to vector<2x64xf32>
    %24 = arith.addf %20, %23 : vector<2x64xf32>
    %25 = vector.extract_strided_slice %24 {offsets = [0, 0], sizes = [2, 3], strides = [1, 1]} : vector<2x64xf32> to vector<2x3xf32>
    %c0_16 = arith.constant 0 : index
    %c0_17 = arith.constant 0 : index
    %26 = vector.load %arg3[%c0_16, %c0_17] : memref<2x3xf32, #tpu.memory_space<vmem>>, vector<2x3xf32>
    tpu.vector_store %arg3[%c0_16, %c0_17], %25 {strides = array<i32>} : memref<2x3xf32, #tpu.memory_space<vmem>>, vector<2x3xf32>,
    return
  }
  func.func @transform_0(%arg0: i32) -> (i32, i32, i32) {
    %c0_i32 = arith.constant 0 : i32
    %c0_i32_0 = arith.constant 0 : i32
    %c0_i32_1 = arith.constant 0 : i32
    return %arg0, %c0_i32, %c0_i32_0 : i32, i32, i32
  }
  func.func @transform_1(%arg0: i32) -> (i32, i32) {
    %c0_i32 = arith.constant 0 : i32
    %c0_i32_0 = arith.constant 0 : i32
    %c0_i32_1 = arith.constant 0 : i32
    return %c0_i32, %c0_i32_0 : i32, i32
  }
  func.func @transform_2(%arg0: i32) -> (i32, i32) {
    %c0_i32 = arith.constant 0 : i32
    %c0_i32_0 = arith.constant 0 : i32
    return %arg0, %c0_i32 : i32, i32
  }
}

</mosaic_0001>

<bundles_post_ra>
// kernel: tpu_custom_call.1
= control target key start
LH: loop header
LB: loop body
LE: loop exit
PB: predicated region body
PF: predicated region fallthrough
CT: control target
= control target key end

     0   :  { %vm20_vm0 = vcmask 1043456   ;;  %s536_s0 = inlined_call_operand.vmem [shape: f32[2,4,256], index: 0, kind: input, shape index: {}]   ;;  %s537_s1 = inlined_call_operand.vmem [shape: f32[160,64], index: 1, kind: input, shape index: {}]   ;;  %s538_s2 = inlined_call_operand.hbm [shape: f32[2,3], index: 2, kind: output, shape index: {}]  }
   0x1   :  { %v12_v0 = vld [vmem:[%s536_s0] sm:$0xff]  ;;  %v13_v1 = vld [vmem:[%s536_s0 + $0x8] sm:$0xff] }
   0x2   :  { %7 = vsyncpa [#allocation3], 0  ;;  %v16_v2 = vcombine.high %v12_v0, %v12_v0  ;;  %v21_v3 = vsel %vm20_vm0, %v12_v0, 0.0  ;;  %v17_v4 = vcombine.high %v13_v1, %v13_v1  ;;  %v26_v6 = vsel %vm20_vm0, %v13_v1, 0.0  ;;  %v34_v10 = vld [vmem:[%s537_s1] sm:$0xf] }
   0x3   :  { %v419_v11 = vmov 0.0   ;;  %vm420_vm1 = vmmov 0   ;;  %v43_v12 = vld [vmem:[%s537_s1 + $0x48] sm:$0xff]  ;;  %v42_v13 = vld [vmem:[%s537_s1 + $0x40] sm:$0xff]  ;;  %v41_v14 = vld [vmem:[%s537_s1 + $0x38] sm:$0xff]  ;;  %v60_v18 = vlaneseq  ;;  %vm70_vm2 = vcmask 1041409  }
   0x4   :  { %v22_v5 = vsel %vm20_vm0, %v16_v2, 0.0  ;;  %v27_v7 = vsel %vm20_vm0, %v17_v4, 0.0  ;;  %349 = vmatprep.subr.mxu0 %v419_v11  ;;  %351 = vmatprep.mubr.msk.f32.mxu0 %vm420_vm1, %v419_v11  ;;  %v40_v15 = vld [vmem:[%s537_s1 + $0x30] sm:$0xff]  ;;  %v39_v16 = vld [vmem:[%s537_s1 + $0x28] sm:$0xff]  ;;  %v38_v17 = vld [vmem:[%s537_s1 + $0x20] sm:$0xff]  ;;  %vm72_vm3 = vcmask 31744  }
   0x5   :  { %v23_v8 = vadd.f32 %v22_v5, %v21_v3  ;;  %v28_v9 = vadd.f32 %v27_v7, %v26_v6  ;;  %350 = vmatpush3.msk.msra.mxu0 %vm20_vm0, %v34_v10  ;;  %354 = vmatprep.subr.mxu1 %v419_v11  ;;  %v61_v19 = vand.u32 127, %v60_v18  ;;  %v63_v20 = vshrl.u32 %v60_v18, 7  ;;  %v37_v29 = vld [vmem:[%s537_s1 + $0x18] sm:$0xff]  ;;  %v36_v30 = vld [vmem:[%s537_s1 + $0x10] sm:$0xff]  ;;  %v51_v32 = vld [vmem:[%s537_s1 + $0x88] sm:$0xff]  ;;  %s421_s23 = smov [#allocation2]  }
   0x6   :  { %370 = vmatprep.mubr.msk.f32.mxu1 %vm420_vm1, %v419_v11  ;;  %373 = vmatprep.subr.mxu0 %v419_v11  ;;  %v52_v31 = vld [vmem:[%s537_s1 + $0x90] sm:$0xff]  ;;  %v50_v33 = vld [vmem:[%s537_s1 + $0x80] sm:$0xff]  ;;  %v49_v34 = vld [vmem:[%s537_s1 + $0x78] sm:$0xff]  ;;  %vm152_vm4 = vcmask 523264   ;;  %s315_s24 = sshll.u32 %s421_s23, 4  ;;  %vm307_vm5 = vcmask 17408   ;;  %s316_s24 = int_to_ptr.vmem [resolvable:$true] %s315_s24 }
   0x7   :  { %24 = vadd.xlane.f32.xlu0 %v23_v8  ;;  %355 = vmatpush3.msra.mxu1 %v43_v12  ;;  %v64_v22 = vsub.s32 %v61_v19, %v63_v20  ;;  %v48_v35 = vld [vmem:[%s537_s1 + $0x70] sm:$0xff]  ;;  %v323_v36 = vld [vmem:[%s537_s1 + $0x8] ss:$0 sm:$0xff]  ;;  %v46_v41 = vld [vmem:[%s537_s1 + $0x60] sm:$0xff]  ;;  %v304_v50 = vsub.s32 0, %v63_v20  ;;  %s397_s25 = scalar_lea.vmem %s316_s24, 32  ;;  %p402_p1 = scmp.lt.s32.totalorder %s316_s24, %s316_s24 }
   0x8   :  { %356 = vmatprep.subr.mxu1 %v419_v11  ;;  %v47_v40 = vld [vmem:[%s537_s1 + $0x68] sm:$0xff]  ;;  %v45_v42 = vld [vmem:[%s537_s1 + $0x58] sm:$0xff]  ;;  %v326_v43 = vld [vmem:[%s537_s1 + $0x50] ss:$0 sm:$0xff]  ;;  %p398_p0 = scmp.ne.s32.totalorder %s316_s24, %s397_s25  ;;  %p403_p2 = scmp.lt.s32.totalorder %s397_s25, %s397_s25 }
   0x9   :  { %357 = vmatpush3.msra.mxu1 %v42_v13  ;;  %v53_v48 = vld [vmem:[%s537_s1 + $0x98] sm:$0x1] }
   0xa   :  { %358 = vmatprep.subr.mxu1 %v419_v11  ;;  %v301_v49 = vmul.f32 0.5, %v53_v48  ;;  %p404_p3 = por %p403_p2, %p402_p1 }
   0xb   :  { %29 = vadd.xlane.f32.xlu0 %v28_v9  ;;  %359 = vmatpush3.msra.mxu1 %v41_v14 }
   0xc   :  { %360 = vmatprep.subr.mxu1 %v419_v11  ;;  %v305_v51 = vrot.slane %v301_v49, %v304_v50  ;;  %p405_p4 = pnand %p404_p3, %p398_p0 }
   0xd   :  { %361 = vmatpush3.msra.mxu1 %v40_v15 }
   0xe   :  { %362 = vmatprep.subr.mxu1 %v419_v11 }
   0xf   :  { %363 = vmatpush3.msra.mxu1 %v39_v16 }
  0x10   :  { %364 = vmatprep.subr.mxu1 %v419_v11 }
  0x11   :  { %365 = vmatpush3.msra.mxu1 %v38_v17 }
  0x12   :  { %366 = vmatprep.subr.mxu1 %v419_v11 }
  0x13   :  { %367 = vmatpush3.msra.mxu1 %v37_v29 }
  0x14   :  { %368 = vmatprep.subr.mxu1 %v419_v11 }
  0x15   :  { %369 = vmatpush3.msra.mxu1 %v36_v30 }
  0x90   :  { %v25_v21 = vpop.xlane.xlu0 %24 }
  0x91   :  { %v32_v23 = vmul.f32 0.00390625, %v25_v21 }
  0x93   :  { %v65_v26 = vrot.slane %v32_v23, %v64_v22 }
  0x94   :  { %v30_v24 = vpop.xlane.xlu0 %29 }
  0x95   :  { %v33_v25 = vmul.f32 0.00390625, %v30_v24 }
  0x97   :  { %v69_v27 = vrot.slane %v33_v25, %v64_v22 }
  0x99   :  { %v71_v28 = vsel %vm70_vm2, %v69_v27, %v65_v26 }
  0x9a   :  { %352 = vmatmul.mubr.msk.f32.vlgmr.msra.gmra.mxu0 %vm72_vm3, %v71_v28 }
  0x9b   :  { %389 = vmatprep.mubr.msk.f32.mxu0 %vm420_vm1, %v419_v11  ;;  %374 = vmatpush3.msra.mxu0 %v52_v31 }
  0x9c   :  { %375 = vmatprep.subr.mxu0 %v419_v11 }
  0x9d   :  { %376 = vmatpush3.msra.mxu0 %v51_v32 }
  0x9e   :  { %377 = vmatprep.subr.mxu0 %v419_v11 }
  0x9f   :  { %378 = vmatpush3.msra.mxu0 %v50_v33 }
  0xa0   :  { %379 = vmatprep.subr.mxu0 %v419_v11 }
  0xa1   :  { %380 = vmatpush3.msra.mxu0 %v49_v34 }
  0xa2   :  { %381 = vmatprep.subr.mxu0 %v419_v11 }
  0xa3   :  { %382 = vmatpush3.msra.mxu0 %v48_v35 }
  0xa4   :  { %383 = vmatprep.subr.mxu0 %v419_v11 }
  0xa5   :  { %384 = vmatpush3.msra.mxu0 %v47_v40 }
  0xa6   :  { %385 = vmatprep.subr.mxu0 %v419_v11 }
  0xa7   :  { %386 = vmatpush3.msra.mxu0 %v46_v41 }
  0xa8   :  { %387 = vmatprep.subr.mxu0 %v419_v11 }
  0xa9   :  { %388 = vmatpush3.msra.mxu0 %v45_v42 }
 0x15a   :  { %v144_v37 = vpop.f32.mrf.mxu0 }
 0x15b   :  { %v145_v38 = vadd.f32 %v323_v36, %v144_v37 }
 0x15c   :  { %v353_v39 = vpop.f32.mrf.mxu0 }
 0x15d   :  { %371 = vmatmul.mubr.msk.f32.vlgmr.msra.gmra.mxu1 %vm152_vm4, %v145_v38 }
 0x21d   :  { %v222_v44 = vpop.f32.mrf.mxu1 }
 0x21e   :  { %v223_v45 = vadd.f32 %v326_v43, %v222_v44 }
 0x21f   :  { %v372_v46 = vpop.f32.mrf.mxu1 }
 0x220   :  { %v226_v47 = vmax.f32 %v223_v45, 0.0 }
 0x222   :  { %390 = vmatmul.mubr.msk.f32.vlgmr.msra.gmra.mxu0 %vm152_vm4, %v226_v47 }
 0x2e2   :  { %v296_v52 = vpop.f32.mrf.mxu0 }
 0x2e3   :  { %v300_v53 = vmul.f32 0.25, %v296_v52 }
 0x2e4   :  { %v391_v54 = vpop.f32.mrf.mxu0 }
 0x2e5   :  { %v306_v55 = vadd.f32 %v305_v51, %v300_v53 }
 0x2e7   :  { %308 = vst.msk [vmem:[#allocation2] sm:$0x3] %vm307_vm5, %v306_v55 }
 0x2e8   :  { %408 = shalt.err (!%p405_p4)
}
 0x2e9   :  { %318 = dma.vmem_to_hbm [thread:$0]  %s316_s24, 32, %s538_s2, [#allocation3]  }
 0x2ea   :  { %417 = dma.done.wait [#allocation3], 32  }
 0x2eb   :  { %418 = vsyncadd [#allocation3], 4294967264 }
 0x2ec   :  { %322 = vsyncpa [#allocation3], 1 }

</bundles_post_ra>
